<compile_context>
chip_gen: v7x
topology: tpu7x:2x2x1
jax: 0.10.0
libtpu: 0.0.40
codegen_flags: <defaults>
</compile_context>

<pallas_src>
import math

import jax
import jax.numpy as jnp
from jax.experimental import pallas as pl
from jax.experimental.pallas import tpu as pltpu

LANE = 128
SUBLANE = 8


def _round_up(x, m):
    return (x + m - 1) // m * m


# ----------------------------- Pallas kernels --------------------------------
def _proj_kernel(x_ref, w_ref, o_ref):
    # Hoisted feature projection: o_tile = x_tile @ W1 (computed once, not
    # once per adjacency K-tile).
    o_ref[...] = jnp.dot(x_ref[...], w_ref[...],
                         preferred_element_type=jnp.float32).astype(o_ref.dtype)


def _layer1_kernel(adj_ref, xw_ref, b1_ref, w2_ref, o_ref, acc_ref):
    # acc += adj(i,k) @ XW1(k);  at last k:  h = relu(acc + b1);  o = h @ [Wmu|Wlv]
    k = pl.program_id(1)

    @pl.when(k == 0)
    def _():
        acc_ref[...] = jnp.zeros_like(acc_ref)

    acc_ref[...] += jnp.dot(adj_ref[...], xw_ref[...],
                            preferred_element_type=jnp.float32)

    @pl.when(k == pl.num_programs(1) - 1)
    def _():
        h = jnp.maximum(acc_ref[...] + b1_ref[...], 0.0)
        o_ref[...] = jnp.dot(h.astype(w2_ref.dtype), w2_ref[...],
                             preferred_element_type=jnp.float32
                             ).astype(o_ref.dtype)


def _layer2_kernel(adj_ref, hw_ref, b2_ref, o_ref, acc_ref):
    # acc += adj(i,k) @ HW2(k);  at last k:  o = acc + [bmu|blv]
    k = pl.program_id(1)

    @pl.when(k == 0)
    def _():
        acc_ref[...] = jnp.zeros_like(acc_ref)

    acc_ref[...] += jnp.dot(adj_ref[...], hw_ref[...],
                            preferred_element_type=jnp.float32)

    @pl.when(k == pl.num_programs(1) - 1)
    def _():
        o_ref[...] = (acc_ref[...] + b2_ref[...]).astype(o_ref.dtype)


# ------------------------------ wrapper --------------------------------------
def _vmem_limit_bytes():
    # Per-generation scoped-VMEM limit: ~3/4 of physical capacity
    # (128 MiB chips -> 96 MiB, v7x 64 MiB -> 48 MiB), never below 32 MiB.
    cap = 64 * 1024 * 1024
    try:
        info = pltpu.get_tpu_info()
        cap = int(getattr(info, "vmem_capacity_bytes", cap) or cap)
    except Exception:
        pass
    return max(32 * 1024 * 1024, cap * 3 // 4)


def vgae_forward(adj, x, w1, b1, wmu, bmu, wlv, blv, *,
                 row_tile=512, k_tile=512, compute_dtype=jnp.bfloat16):
    n = adj.shape[0]
    node_dim = x.shape[1]
    hidden = w1.shape[1]
    out_dim = wmu.shape[1]
    f32 = jnp.float32

    # ---- lane-dense padded feature dims (128 lanes -> unmasked vst) ----
    hidden_p = _round_up(hidden, LANE)
    out2_p = _round_up(2 * out_dim, LANE)

    # ---- tile sizes: rows multiple of 8 (sublane), K multiple of 128 (lane) ----
    tm = _round_up(max(SUBLANE, min(row_tile, _round_up(n, SUBLANE))), SUBLANE)
    tk = _round_up(max(LANE, min(k_tile, _round_up(n, LANE))), LANE)
    n_pad = _round_up(n, math.lcm(tm, tk))     # zero-pad N instead of asserting
    gi, gk = n_pad // tm, n_pad // tk

    # ---- fuse mu/logvar weights; zero-pad features (zeros never leak) ----
    w1p = jnp.pad(w1, ((0, 0), (0, hidden_p - hidden))).astype(compute_dtype)
    b1p = jnp.pad(b1, ((0, 0), (0, hidden_p - hidden))).astype(f32)
    w2 = jnp.concatenate([wmu, wlv], axis=1)          # [hidden, 2*out]
    b2 = jnp.concatenate([bmu, blv], axis=1)          # [1, 2*out]
    w2p = jnp.pad(w2, ((0, hidden_p - hidden),
                       (0, out2_p - 2 * out_dim))).astype(compute_dtype)
    b2p = jnp.pad(b2, ((0, 0), (0, out2_p - 2 * out_dim))).astype(f32)

    adj_p = jnp.pad(adj, ((0, n_pad - n), (0, n_pad - n))).astype(compute_dtype)
    x_p = jnp.pad(x, ((0, n_pad - n), (0, 0))).astype(compute_dtype)

    vmem_limit = _vmem_limit_bytes()
    cparams_1d = pltpu.CompilerParams(dimension_semantics=("parallel",),
                                      vmem_limit_bytes=vmem_limit)
    cparams_2d = pltpu.CompilerParams(
        dimension_semantics=("parallel", "arbitrary"),
        vmem_limit_bytes=vmem_limit)

    # Constant-index operands: single-buffered (no pointless double-buffering).
    def const2(shape):
        return pl.BlockSpec(shape, lambda i, k: (0, 0),
                            pipeline_mode=pl.Buffered(1))

    # ---- hoisted projection: XW1 = X @ W1 (once over all nodes) ----
    xw1 = pl.pallas_call(
        _proj_kernel,
        out_shape=jax.ShapeDtypeStruct((n_pad, hidden_p), compute_dtype),
        grid=(n_pad // tk,),
        in_specs=[pl.BlockSpec((tk, node_dim), lambda i: (i, 0)),
                  pl.BlockSpec((node_dim, hidden_p), lambda i: (0, 0),
                               pipeline_mode=pl.Buffered(1))],
        out_specs=pl.BlockSpec((tk, hidden_p), lambda i: (i, 0)),
        compiler_params=cparams_1d,
    )(x_p, w1p)

    # ---- layer 1 (fused): HW2 = relu(A_hat @ XW1 + b1) @ [Wmu|Wlv] ----
    # (h itself never touches HBM.)
    hw2 = pl.pallas_call(
        _layer1_kernel,
        out_shape=jax.ShapeDtypeStruct((n_pad, out2_p), compute_dtype),
        grid=(gi, gk),
        in_specs=[pl.BlockSpec((tm, tk), lambda i, k: (i, k)),       # adj stream
                  pl.BlockSpec((tk, hidden_p), lambda i, k: (k, 0)),  # XW1 stream
                  const2((1, hidden_p)),                              # b1
                  const2((hidden_p, out2_p))],                        # fused W2
        out_specs=pl.BlockSpec((tm, out2_p), lambda i, k: (i, 0)),
        scratch_shapes=[pltpu.VMEM((tm, hidden_p), jnp.float32)],
        compiler_params=cparams_2d,
    )(adj_p, xw1, b1p, w2p)

    # ---- layer 2: [mu|logvar] = A_hat @ HW2 + [bmu|blv] ----
    out = pl.pallas_call(
        _layer2_kernel,
        out_shape=jax.ShapeDtypeStruct((n_pad, out2_p), jnp.float32),
        grid=(gi, gk),
        in_specs=[pl.BlockSpec((tm, tk), lambda i, k: (i, k)),       # adj stream
                  pl.BlockSpec((tk, out2_p), lambda i, k: (k, 0)),    # HW2 stream
                  const2((1, out2_p))],                               # fused bias
        out_specs=pl.BlockSpec((tm, out2_p), lambda i, k: (i, 0)),
        scratch_shapes=[pltpu.VMEM((tm, out2_p), jnp.float32)],
        compiler_params=cparams_2d,
    )(adj_p, hw2, b2p)

    mu = out[:n, :out_dim]
    logvar = out[:n, out_dim:2 * out_dim]
    return mu, logvar


# ------------------------------- JAX glue ------------------------------------
def gcn_norm_dense(edge_index, num_nodes):
    """Dense equivalent of PyG gcn_norm (add_remaining_self_loops=True).

    Existing self-loops are replaced by exactly one weight-1 self-loop per node;
    duplicate non-self edges each contribute weight 1.
    """
    # TODO(synk): edge_index scatter-add has no clean Pallas equivalent; the
    # adjacency build stays as plain-JAX glue (all matmuls run in Pallas).
    src = edge_index[0]
    dst = edge_index[1]
    w = jnp.where(src == dst, 0.0, 1.0)               # drop existing self-loops
    m = jnp.zeros((num_nodes, num_nodes), jnp.float32).at[dst, src].add(w)
    m = m + jnp.eye(num_nodes, dtype=jnp.float32)     # one self-loop per node
    deg = jnp.sum(m, axis=1)
    dinv = jnp.where(deg > 0, jax.lax.rsqrt(deg), 0.0)
    return dinv[:, None] * m * dinv[None, :]


def init_params(key, node_dict_size, node_dim, hidden_dim, output_dim):
    ks = jax.random.split(key, 5)
    # Embedding weight: normal(0, node_dim^-0.5) per VGAE.initialize_parameters.
    # (Not used in forward — kept only to mirror __init__.)
    emb = jax.random.normal(ks[0], (node_dict_size, node_dim),
                            jnp.float32) * node_dim ** (-0.5)

    def glorot(k, fan_in, fan_out):
        limit = jnp.sqrt(6.0 / (fan_in + fan_out))
        return jax.random.uniform(k, (fan_in, fan_out), jnp.float32,
                                  -limit, limit)

    w1 = glorot(ks[1], node_dim, hidden_dim)
    b1 = jnp.zeros((1, hidden_dim), jnp.float32)
    wmu = glorot(ks[2], hidden_dim, output_dim)
    bmu = jnp.zeros((1, output_dim), jnp.float32)
    wlv = glorot(ks[3], hidden_dim, output_dim)
    blv = jnp.zeros((1, output_dim), jnp.float32)
    return emb, (w1, b1, wmu, bmu, wlv, blv)


def reference_forward(adj, x, w1, b1, wmu, bmu, wlv, blv):
    h = jnp.maximum(adj @ (x @ w1) + b1, 0.0)
    mu = adj @ (h @ wmu) + bmu
    lv = adj @ (h @ wlv) + blv
    return mu, lv


# --------------------------------- main ---------------------------------------
if __name__ == "__main__":
    key = jax.random.PRNGKey(0)
    k_x, k_e, k_p = jax.random.split(key, 3)

    # Small, forward-consistent shapes. num_nodes is intentionally NOT a tile
    # multiple, exercising the zero-padding path.
    num_nodes = 200
    node_dict_size = 64   # embedding table size (unused by forward)
    node_dim = 8
    hidden_dim = 32
    output_dim = 16
    num_edges = 600

    x = jax.random.normal(k_x, (num_nodes, node_dim), jnp.float32)
    edge_index = jax.random.randint(k_e, (2, num_edges), 0, num_nodes,
                                    dtype=jnp.int32)

    _, params = init_params(k_p, node_dict_size, node_dim,
                            hidden_dim, output_dim)
    adj = gcn_norm_dense(edge_index, num_nodes)
    mu_ref, lv_ref = reference_forward(adj, x, *params)

    # f32 path (tight correctness check). row_tile=64 / k_tile=128 so the toy
    # graph still exercises the 2-D (rows x K) accumulator grid: n_pad=256,
    # grid=(4, 2).
    mu, logvar = vgae_forward(adj, x, *params, row_tile=64, k_tile=128,
                              compute_dtype=jnp.float32)
    jax.block_until_ready((mu, logvar))
    assert mu.shape == (num_nodes, output_dim)
    assert logvar.shape == (num_nodes, output_dim)
    assert jnp.allclose(mu, mu_ref, atol=1e-5, rtol=1e-5)
    assert jnp.allclose(logvar, lv_ref, atol=1e-5, rtol=1e-5)

    # bf16 path (the default for realistic graph sizes: halves the HBM-bound
    # A_hat / HW2 streams). Only input rounding differs (all accumulation stays
    # f32), so compare against the f32 reference with a loose tolerance.
    mu_bf, lv_bf = vgae_forward(adj, x, *params, row_tile=64, k_tile=128,
                                compute_dtype=jnp.bfloat16)
    jax.block_until_ready((mu_bf, lv_bf))
    assert jnp.allclose(mu_bf, mu_ref, atol=1e-1, rtol=1e-1)
    assert jnp.allclose(lv_bf, lv_ref, atol=1e-1, rtol=1e-1)

    print("KERNEL_OK")
</pallas_src>

<mosaic_0001>
module attributes {stable_mosaic.version = 11 : i64} {
  func.func @_proj_kernel(%arg0: i32, %arg1: memref<128x8xf32, #tpu.memory_space<vmem>>, %arg2: memref<8x128xf32, #tpu.memory_space<vmem>>, %arg3: memref<128x128xf32, #tpu.memory_space<vmem>>) attributes {dimension_semantics = [#tpu.dimension_semantics<parallel>], iteration_bounds = array<i64: 2>, scalar_prefetch = 0 : i64, scratch_operands = 0 : i64, tpu.core_type = #tpu.core_type<tc>, window_params = [{transform_indices = @transform_0, window_bounds = array<i64: 128, 8>}, {pipeline_mode = #tpu.pipeline_mode<synchronous>, transform_indices = @transform_1, window_bounds = array<i64: 8, 128>}, {transform_indices = @transform_2, window_bounds = array<i64: 128, 128>}]} {
    %c0 = arith.constant 0 : index
    %c0_0 = arith.constant 0 : index
    %0 = vector.load %arg1[%c0, %c0_0] : memref<128x8xf32, #tpu.memory_space<vmem>>, vector<128x8xf32>
    %c0_1 = arith.constant 0 : index
    %c0_2 = arith.constant 0 : index
    %1 = vector.load %arg2[%c0_1, %c0_2] : memref<8x128xf32, #tpu.memory_space<vmem>>, vector<8x128xf32>
    %cst = arith.constant dense<0.000000e+00> : vector<128x128xf32>
    %2 = tpu.matmul %0, %1, %cst {dimension_numbers = #tpu.dot_dimension_numbers<[1], [0], [0], [1], [0, 0, 1, 1], [], []>} : vector<128x8xf32>, vector<8x128xf32>, vector<128x128xf32> -> vector<128x128xf32>
    %c0_3 = arith.constant 0 : index
    %c0_4 = arith.constant 0 : index
    %3 = vector.load %arg3[%c0_3, %c0_4] : memref<128x128xf32, #tpu.memory_space<vmem>>, vector<128x128xf32>
    tpu.vector_store %arg3[%c0_3, %c0_4], %2 {strides = array<i32>} : memref<128x128xf32, #tpu.memory_space<vmem>>, vector<128x128xf32>,
    return
  }
  func.func @transform_0(%arg0: i32) -> (i32, i32) {
    %c0_i32 = arith.constant 0 : i32
    %c0_i32_0 = arith.constant 0 : i32
    return %arg0, %c0_i32 : i32, i32
  }
  func.func @transform_1(%arg0: i32) -> (i32, i32) {
    %c0_i32 = arith.constant 0 : i32
    %c0_i32_0 = arith.constant 0 : i32
    %c0_i32_1 = arith.constant 0 : i32
    return %c0_i32, %c0_i32_0 : i32, i32
  }
  func.func @transform_2(%arg0: i32) -> (i32, i32) {
    %c0_i32 = arith.constant 0 : i32
    %c0_i32_0 = arith.constant 0 : i32
    return %arg0, %c0_i32 : i32, i32
  }
}

</mosaic_0001>

<bundles_post_ra>
// kernel: tpu_custom_call.1
= control target key start
LH: loop header
LB: loop body
LE: loop exit
PB: predicated region body
PF: predicated region fallthrough
CT: control target
= control target key end

     0   :  { %7 = vsyncpa [#allocation3], 0  ;;  %s789_s0 = inlined_call_operand.vmem [shape: f32[256,8], index: 0, kind: input, shape index: {}]   ;;  %s790_s1 = inlined_call_operand.vmem [shape: f32[8,128], index: 1, kind: input, shape index: {}]   ;;  %s791_s2 = inlined_call_operand.hbm [shape: f32[256,128], index: 2, kind: output, shape index: {}]  }
   0x1   :  { %9 = vsyncpa [#allocation3 + $0x1], 0  ;;  %s645_s9 = smov 0   ;;  %s647_s10 = smov 0  }
   0x2   :  { %s649_s11 = smov 0   ;;  %s651_s12 = smov 0  }
   0x3 LB: > { %s666_s13 = sadd.s32 4294967295, %s625_s12   ;;  %s448_s14 = sadd.s32 4294967294, %s625_s12   ;;  %s625_s12 = sphi %s651_s12, %s797_s12   ;;  %s621_s11 = sphi %s649_s11, %s796_s11   ;;  %s617_s10 = sphi %s647_s10, %s795_s10   ;;  %s613_s9 = sphi %s645_s9, %s794_s9  }
   0x4   : > { %s670_s15 = sadd.s32 1, %s625_s12   ;;  %s69_s16 = sadd.s32 1, %s621_s11 }
   0x5   : > { %s66_s17 = ssub.s32 %s625_s12, %s670_s15  ;;  %p79_p0 = scmp.ne.s32.totalorder %s621_s11, %s617_s10 }
   0x6   : > { %p67_p1 = scmp.eq.s32.totalorder %s66_s17, 0  ;;  %p80_p2 = scmp.eq.s32.totalorder %s666_s13, 1 }
   0x7   : > { %p85_p3 = scmp.ne.s32.totalorder %s617_s10, %s613_s9  ;;  %p86_p4 = scmp.eq.s32.totalorder %s448_s14, 1 }
   0x8   : > { %s681_s18 = scalar_select %p67_p1, %s621_s11, %s69_s16  }
   0x9   : > { %p683_p5 = por %p80_p2, %p79_p0  ;;  %p687_p6 = por %p86_p4, %p85_p3 }
   0xa   : > { %p451_p7 = scmp.ge.s32.totalorder %s625_s12, 1  ;;  %p116_p8 = scmp.lt.s32.totalorder %s625_s12, 3 }
   0xc   : > { %p117_p9 = pnand %p451_p7, %p116_p8 }
   0xd   : > { %v161_v0 = vld [vmem:[%s790_s1] sm:$0xff] (!%p117_p9)  ;;  %s453_s23 = sshll.u32 (!%p117_p9), %s666_s13, 4  ;;  %vm162_vm0 = vcmask (!%p117_p9), 64512   ;;  %s135_s28 = sand.u32 (!%p117_p9), 1, %s617_s10  }
   0xe   : > { %120 = sbr.rel (%p117_p9) target bundleno = 267 (0x10b), region = 28  ;;  %494 = vmatprep.subr.mxu0 (!%p117_p9), %v161_v0  ;;  %520 = vmatprep.subr.mxu1 (!%p117_p9), %v161_v0  ;;  %p139_p10 = scmp.lt.s32.totalorder (!%p117_p9), %s453_s23, 31 }
   0xf   : > { %495 = vmatpush3.msra.mxu0 (!%p117_p9), %v161_v0  ;;  %521 = vmatpush3.msra.mxu1 (!%p117_p9), %v161_v0  ;;  %s452_s29 = sshll.u32 (!%p117_p9), %s135_s28, 7  ;;  %s476_s3 = sshll.u32 (!%p117_p9), %s666_s13, 11 }
  0x10   : > { %s719_s30 = scalar_lea.vmem (!%p117_p9), [#allocation2], %s452_s29  ;;  %s738_s7 = scalar_lea.hbm (!%p117_p9), %s791_s2, %s476_s3 }
  0x11   : > { %s386_s4 = sshll.u32 (!%p117_p9), %s719_s30, 4  ;;  %s748_s8 = scalar_lea.sflag (!%p117_p9), [#allocation3], %s135_s28  ;;  %s740_s4 = int_to_ptr.vmem [resolvable:$true] %s386_s4 }
  0x12   : > { %s563_s13 = scalar_lea.vmem (!%p117_p9), %s740_s4, 2048  ;;  %s627_s14 = smov (!%p117_p9), [#allocation2]  }
  0x13   : > { %p564_p11 = scmp.ne.s32.totalorder (!%p117_p9), %s740_s4, %s563_s13  ;;  %s567_s16 = sshll.u32 (!%p117_p9), %s627_s14, 4  ;;  %s568_s16 = int_to_ptr.vmem [resolvable:$false] %s567_s16 }
  0x14   : > { %s569_s17 = scalar_lea.vmem (!%p117_p9), %s568_s16, 4096  ;;  %p570_p0 = scmp.lt.s32.totalorder (!%p117_p9), %s740_s4, %s568_s16 }
  0x15   : > { %s799_s23 = smov (!%p139_p10, %s453_s23), 31  ;;  %p565_p12 = pnand %p564_p11, %p683_p5 }
  0x16   : > { %s454_s24 = sshll.u32 %s799_s23, 3  ;;  %p571_p1 = scmp.lt.s32.totalorder %s569_s17, %s563_s13 }
  0x17   : > { %s142_s27 = scalar_lea.vmem %s789_s0, %s454_s24  ;;  %p566_p13 = pneg %p565_p12 }
  0x18   : > { %v145_v1 = vld [vmem:[%s142_s27] sm:$0xff]  ;;  %v146_v3 = vld [vmem:[%s142_s27 + $0x8] sm:$0xff]  ;;  %v147_v5 = vld [vmem:[%s142_s27 + $0x10] sm:$0xff]  ;;  %p572_p2 = por %p571_p1, %p570_p0 }
  0x19   : > { %v153_v2 = vld [vmem:[%s142_s27 + $0x40] sm:$0xff]  ;;  %496 = vmatprep.mubr.msk.f32.mxu0 %vm162_vm0, %v145_v1  ;;  %v154_v4 = vld [vmem:[%s142_s27 + $0x48] sm:$0xff]  ;;  %v155_v6 = vld [vmem:[%s142_s27 + $0x50] sm:$0xff] }
  0x1a   : > { %508 = vmatprep.mubr.msk.f32.mxu1 %vm162_vm0, %v153_v2  ;;  %497 = vmatmul.mubr.msk.f32.vlgmr.msra.gmra.mrb[0].mxu0 %vm162_vm0, %v146_v3  ;;  %v148_v7 = vld [vmem:[%s142_s27 + $0x18] sm:$0xff]  ;;  %v149_v9 = vld [vmem:[%s142_s27 + $0x20] sm:$0xff]  ;;  %v150_v11 = vld [vmem:[%s142_s27 + $0x28] sm:$0xff]  ;;  %p573_p3 = pnand %p572_p2, %p566_p13 }
  0x1b   : > { %509 = vmatmul.mubr.msk.f32.vlgmr.msra.gmra.mrb[0].mxu1 %vm162_vm0, %v154_v4  ;;  %499 = vmatprep.mubr.msk.f32.mxu0 %vm162_vm0, %v147_v5  ;;  %v156_v8 = vld [vmem:[%s142_s27 + $0x58] sm:$0xff]  ;;  %v157_v10 = vld [vmem:[%s142_s27 + $0x60] sm:$0xff]  ;;  %v158_v12 = vld [vmem:[%s142_s27 + $0x68] sm:$0xff] }
  0x1c   : > { %511 = vmatprep.mubr.msk.f32.mxu1 %vm162_vm0, %v155_v6  ;;  %v151_v13 = vld [vmem:[%s142_s27 + $0x30] sm:$0xff]  ;;  %v152_v15 = vld [vmem:[%s142_s27 + $0x38] sm:$0xff] }
  0x1d   : > { %v159_v14 = vld [vmem:[%s142_s27 + $0x70] sm:$0xff]  ;;  %v160_v16 = vld [vmem:[%s142_s27 + $0x78] sm:$0xff] }
  0x1e   : > { %500 = vmatmul.mubr.msk.f32.gmra.mrb[2].mxu0 %vm162_vm0, %v148_v7 }
  0x1f   : > { %512 = vmatmul.mubr.msk.f32.gmra.mrb[2].mxu1 %vm162_vm0, %v156_v8  ;;  %502 = vmatprep.mubr.msk.f32.mxu0 %vm162_vm0, %v149_v9 }
  0x20   : > { %514 = vmatprep.mubr.msk.f32.mxu1 %vm162_vm0, %v157_v10 }
  0x22   : > { %503 = vmatmul.mubr.msk.f32.gmra.mrb[4].mxu0 %vm162_vm0, %v150_v11 }
  0x23   : > { %515 = vmatmul.mubr.msk.f32.gmra.mrb[4].mxu1 %vm162_vm0, %v158_v12  ;;  %505 = vmatprep.mubr.msk.f32.mxu0 %vm162_vm0, %v151_v13 }
  0x24   : > { %517 = vmatprep.mubr.msk.f32.mxu1 %vm162_vm0, %v159_v14 }
  0x26   : > { %506 = vmatmul.mubr.msk.f32.gmra.mrb[6].mxu0 %vm162_vm0, %v152_v15 }
  0x27   : > { %518 = vmatmul.mubr.msk.f32.gmra.mrb[6].mxu1 %vm162_vm0, %v160_v16 }
  0xed   : > { %v498_v17 = vpop.f32.mrb[0].mxu0 }
  0xee   : > { %v510_v18 = vpop.f32.mrb[0].mxu1  ;;  %357 = vst [vmem:[%s719_s30 + $0x8] sm:$0xff] %v498_v17  ;;  %v277_v19 = vpop.f32.mrb[1].mxu0 }
  0xef   : > { %365 = vst [vmem:[%s719_s30 + $0x48] sm:$0xff] %v510_v18  ;;  %v317_v20 = vpop.f32.mrb[1].mxu1  ;;  %356 = vst [vmem:[%s719_s30] sm:$0xff] %v277_v19 }
  0xf0   : > { %364 = vst [vmem:[%s719_s30 + $0x40] sm:$0xff] %v317_v20 }
  0xf1   : > { %v501_v21 = vpop.f32.mrb[2].mxu0 }
  0xf2   : > { %v513_v22 = vpop.f32.mrb[2].mxu1  ;;  %359 = vst [vmem:[%s719_s30 + $0x18] sm:$0xff] %v501_v21  ;;  %v287_v23 = vpop.f32.mrb[3].mxu0 }
  0xf3   : > { %367 = vst [vmem:[%s719_s30 + $0x58] sm:$0xff] %v513_v22  ;;  %v327_v24 = vpop.f32.mrb[3].mxu1  ;;  %358 = vst [vmem:[%s719_s30 + $0x10] sm:$0xff] %v287_v23 }
  0xf4   : > { %366 = vst [vmem:[%s719_s30 + $0x50] sm:$0xff] %v327_v24 }
  0xf5   : > { %v504_v25 = vpop.f32.mrb[4].mxu0 }
  0xf6   : > { %v516_v26 = vpop.f32.mrb[4].mxu1  ;;  %361 = vst [vmem:[%s719_s30 + $0x28] sm:$0xff] %v504_v25  ;;  %v297_v27 = vpop.f32.mrb[5].mxu0 }
  0xf7   : > { %369 = vst [vmem:[%s719_s30 + $0x68] sm:$0xff] %v516_v26  ;;  %v337_v28 = vpop.f32.mrb[5].mxu1  ;;  %360 = vst [vmem:[%s719_s30 + $0x20] sm:$0xff] %v297_v27 }
  0xf8   : > { %368 = vst [vmem:[%s719_s30 + $0x60] sm:$0xff] %v337_v28 }
  0xf9   : > { %v507_v29 = vpop.f32.mrb[6].mxu0 }
  0xfa   : > { %v519_v30 = vpop.f32.mrb[6].mxu1  ;;  %363 = vst [vmem:[%s719_s30 + $0x38] sm:$0xff] %v507_v29  ;;  %v307_v31 = vpop.f32.mrb[7].mxu0 }
  0xfb   : > { %371 = vst [vmem:[%s719_s30 + $0x78] sm:$0xff] %v519_v30  ;;  %v347_v32 = vpop.f32.mrb[7].mxu1  ;;  %362 = vst [vmem:[%s719_s30 + $0x30] sm:$0xff] %v307_v31 }
  0xfc   : > { %370 = vst [vmem:[%s719_s30 + $0x70] sm:$0xff] %v347_v32 }
  0xfd   : > { %576 = shalt.err (!%p573_p3)
}
  0xfe   : > { %s577_s21 = scalar_lea.hbm %s738_s7, 2048  ;;  %s581_s24 = scalar_lea.hbm %s791_s2, 4096 }
  0xff   : > { %p578_p4 = scmp.ne.s32.totalorder %s738_s7, %s577_s21  ;;  %p582_p9 = scmp.lt.u32.totalorder %s738_s7, %s791_s2 }
 0x100   : > { %p583_p10 = scmp.lt.u32.totalorder %s581_s24, %s577_s21  ;;  %p585_p12 = scmp.lt.u32.totalorder %s577_s21, %s738_s7 }
 0x101   : > { %p579_p7 = pnand %p578_p4, %p683_p5 }
 0x102   : > { %p584_p11 = por %p583_p10, %p582_p9 }
 0x103   : > { %p580_p8 = pneg %p579_p7 }
 0x104   : > { %p586_p13 = por %p585_p12, %p584_p11 }
 0x106   : > { %p587_p0 = pnand %p586_p13, %p580_p8 }
 0x108   : > { %590 = shalt.err (!%p587_p0)
}
 0x109   : > { %s628_s27 = smov 128   ;;  %s629_s28 = smov 8  }
 0x10a   : > { %522 = dma.vmem_to_hbm [thread:$0]  (%p683_p5), %s740_s4, 2048, %s738_s7, %s748_s8, %s628_s27, %s628_s27, %s629_s28  }
 0x10b PF: > { %p528_p1 = scmp.ge.s32.totalorder %s625_s12, 2  ;;  %s401_s29 = sand.u32 1, %s613_s9  }
 0x10c   : > { %s402_s30 = scalar_lea.sflag [#allocation3], %s401_s29 }
 0x10d   : > { %p525_p2 = pnand %p528_p1, %p687_p6 }
 0x10f   : > { %608 = dma.done.wait (!%p525_p2), %s402_s30, 2048  }
 0x110   : > { %610 = vsyncadd (!%p525_p2), %s402_s30, 4294965248  ;;  %p12_p3 = scmp.ge.s32.totalorder %s670_s15, 4   ;;  %s794_s9 = smov %s617_s10 }
 0x111   : > { %s795_s10 = smov %s621_s11  ;;  %s796_s11 = smov %s681_s18 }
 0x112   : > { %s797_s12 = smov %s670_s15  ;;  %14 = sbr.rel (!%p12_p3) target bundleno = 3 (0x3), region = 63 }
 0x119   :  { %407 = vsyncpa [#allocation3], 1 }
 0x11a   :  { %409 = vsyncpa [#allocation3 + $0x1], 1 }

</bundles_post_ra>
